<compile_context>
chip_gen: v7x
topology: tpu7x:2x2x1
jax: 0.10.0
libtpu: 0.0.40
codegen_flags: <defaults>
</compile_context>

<pallas_src>
import jax
import jax.numpy as jnp
from jax.experimental import pallas as pl
from jax.experimental.pallas import tpu as pltpu

IMAGE_SIZE = 784
H0, H1, H2 = 100, 50, 10          # real layer widths
H0P, H1P, H2P = 128, 128, 128     # lane-padded widths
BN_EPS = 1e-5
MAX_TILE = 2048                   # batch rows per grid step
ROW_ALIGN = 16                    # bf16 sublane packing for the output block


def _round_up(n, m):
    return (n + m - 1) // m * m


def _choose_tile(batch, max_tile=MAX_TILE):
    """Tile batch rows: as large as possible (amortize per-step overhead),
    16-row aligned, and >=2 grid steps for big batches so v7x's two
    TensorCores both get work."""
    ntiles = pl.cdiv(batch, max_tile)
    if ntiles < 2 and batch >= 256:
        ntiles = 2
    return _round_up(pl.cdiv(batch, ntiles), ROW_ALIGN)


def _neuralnet_d_kernel(x_ref, w0_ref, b0_ref, w1_ref, b1_ref, w2_ref, b2_ref,
                        o_ref):
    # fc0 (+ folded BatchNorm): cast the streamed f32 rows to bf16 at the MXU
    # boundary; accumulate in f32.
    x = x_ref[...].astype(jnp.bfloat16)
    h0 = jnp.dot(x, w0_ref[...], preferred_element_type=jnp.float32)
    h0 = jnp.maximum(h0 + b0_ref[...], 0.0)

    # fc1 / fc2: bf16 MXU operands (resident bf16 weights), f32 accumulation,
    # f32 bias + ReLU.
    h1 = jnp.dot(h0.astype(jnp.bfloat16), w1_ref[...],
                 preferred_element_type=jnp.float32)
    h1 = jnp.maximum(h1 + b1_ref[...], 0.0)

    h2 = jnp.dot(h1.astype(jnp.bfloat16), w2_ref[...],
                 preferred_element_type=jnp.float32)
    h2 = jnp.maximum(h2 + b2_ref[...], 0.0)

    # Numerically stable log-softmax over the 10 real lanes. Padded lanes are
    # pushed to -1e30, so exp(shifted) underflows to exactly 0 there and no
    # second mask/select is needed inside the sum.
    col = jax.lax.broadcasted_iota(jnp.int32, h2.shape, 1)
    h2m = jnp.where(col < H2, h2, jnp.float32(-1e30))
    m = jnp.max(h2m, axis=1, keepdims=True)
    shifted = h2m - m
    lse = jnp.log(jnp.sum(jnp.exp(shifted), axis=1, keepdims=True))
    o_ref[...] = (shifted - lse).astype(o_ref.dtype)


def neuralnet_d_forward(x, params, *, max_tile=MAX_TILE):
    """x: any shape whose trailing elements flatten to multiples of 784
    (e.g. (B,1,28,28)). params: (w0,b0,w1,b1,w2,b2) with w*: (in,out)."""
    w0, b0, w1, b1, w2, b2 = params
    x2d = x.reshape(-1, IMAGE_SIZE).astype(jnp.float32)   # == x.view(-1, 784)
    B = x2d.shape[0]

    # --- BatchNorm1d(784, affine=False), training mode (module builds it in
    #     forward()): full-batch mean, biased variance, eps=1e-5. Single fused
    #     pass over x (mean + mean-of-squares), f32 accumulators, clamped var.
    mean = jnp.mean(x2d, axis=0)
    mean_sq = jnp.mean(x2d * x2d, axis=0)
    var = jnp.maximum(mean_sq - mean * mean, 0.0)
    inv = jax.lax.rsqrt(var + BN_EPS)
    # Fold BN into fc0: (x-mean)*inv @ w0 + b0 == x @ w0f + b0f.
    w0f = w0 * inv[:, None]
    b0f = b0 - (mean * inv) @ w0

    # --- Zero-pad the (tiny, VMEM-resident) weights to 128-lane multiples.
    def padw(w, rows, cols):
        return jnp.pad(w, ((0, rows - w.shape[0]), (0, cols - w.shape[1])))

    def padb(b, cols):
        return jnp.pad(b, (0, cols - b.shape[0])).reshape(1, cols)

    w0p = padw(w0f, IMAGE_SIZE, H0P).astype(jnp.bfloat16)
    b0p = padb(b0f, H0P).astype(jnp.float32)
    w1p = padw(w1, H0P, H1P).astype(jnp.bfloat16)
    b1p = padb(b1, H1P).astype(jnp.float32)
    w2p = padw(w2, H1P, H2P).astype(jnp.bfloat16)
    b2p = padb(b2, H2P).astype(jnp.float32)

    # --- Batch tiling: no padded copy of x; the last grid step is a partial
    #     block (OOB rows are never written back).
    tile = _choose_tile(B, max_tile)
    grid = pl.cdiv(B, tile)

    out = pl.pallas_call(
        _neuralnet_d_kernel,
        out_shape=jax.ShapeDtypeStruct((B, H2P), jnp.bfloat16),
        grid=(grid,),
        in_specs=[
            pl.BlockSpec((tile, IMAGE_SIZE), lambda i: (i, 0)),   # x tile (f32)
            pl.BlockSpec((IMAGE_SIZE, H0P), lambda i: (0, 0)),    # w0 (resident)
            pl.BlockSpec((1, H0P), lambda i: (0, 0)),             # b0
            pl.BlockSpec((H0P, H1P), lambda i: (0, 0)),           # w1
            pl.BlockSpec((1, H1P), lambda i: (0, 0)),             # b1
            pl.BlockSpec((H1P, H2P), lambda i: (0, 0)),           # w2
            pl.BlockSpec((1, H2P), lambda i: (0, 0)),             # b2
        ],
        out_specs=pl.BlockSpec((tile, H2P), lambda i: (i, 0)),
        compiler_params=pltpu.CompilerParams(
            dimension_semantics=("parallel",),
            vmem_limit_bytes=40 << 20,
        ),
    )(x2d, w0p, b0p, w1p, b1p, w2p, b2p)

    return out[:, :H2].astype(jnp.float32)


def _reference(x, params):
    """Pure-JAX f32 reference matching the PyTorch module."""
    w0, b0, w1, b1, w2, b2 = params
    x2d = x.reshape(-1, IMAGE_SIZE).astype(jnp.float32)
    mean = jnp.mean(x2d, axis=0)
    var = jnp.mean(jnp.square(x2d - mean), axis=0)
    xn = (x2d - mean) * jax.lax.rsqrt(var + BN_EPS)
    h = jnp.maximum(xn @ w0 + b0, 0.0)
    h = jnp.maximum(h @ w1 + b1, 0.0)
    h = jnp.maximum(h @ w2 + b2, 0.0)   # ReLU on logits: matches the module
    return jax.nn.log_softmax(h, axis=1)


def init_params(key):
    """nn.Linear default init U(-1/sqrt(fan_in), 1/sqrt(fan_in)); weights are
    stored (in, out) — i.e. the transpose of PyTorch's (out, in)."""
    ks = jax.random.split(key, 6)

    def lin(kw, kb, fan_in, fan_out):
        bound = 1.0 / jnp.sqrt(float(fan_in))
        w = jax.random.uniform(kw, (fan_in, fan_out), jnp.float32, -bound, bound)
        b = jax.random.uniform(kb, (fan_out,), jnp.float32, -bound, bound)
        return w, b

    w0, b0 = lin(ks[0], ks[1], IMAGE_SIZE, H0)
    w1, b1 = lin(ks[2], ks[3], H0, H1)
    w2, b2 = lin(ks[4], ks[5], H1, H2)
    return (w0, b0, w1, b1, w2, b2)


if __name__ == "__main__":
    key = jax.random.PRNGKey(0)
    kx, kp = jax.random.split(key)

    B = 32  # small demo batch; IMAGE_SIZE fixed by the module (1x28x28)
    x = jax.random.normal(kx, (B, 1, 28, 28), jnp.float32)
    params = init_params(kp)

    out = jax.block_until_ready(neuralnet_d_forward(x, params))

    assert out.shape == (B, H2)
    # log_softmax rows must exponentiate-sum to ~1 (loose: bf16 output store).
    assert jnp.allclose(jnp.sum(jnp.exp(out), axis=1), 1.0, atol=2e-2)
    # Match the f32 reference (loose tolerance: bf16 MXU operands + bf16 out).
    ref = _reference(x, params)
    assert jnp.allclose(out, ref, atol=5e-2, rtol=5e-2)
    print("KERNEL_OK")
</pallas_src>

<mosaic_0001>
module attributes {stable_mosaic.version = 11 : i64} {
  func.func @_neuralnet_d_kernel(%arg0: i32, %arg1: memref<32x784xf32, #tpu.memory_space<vmem>>, %arg2: memref<784x128xbf16, #tpu.memory_space<vmem>>, %arg3: memref<1x128xf32, #tpu.memory_space<vmem>>, %arg4: memref<128x128xbf16, #tpu.memory_space<vmem>>, %arg5: memref<1x128xf32, #tpu.memory_space<vmem>>, %arg6: memref<128x128xbf16, #tpu.memory_space<vmem>>, %arg7: memref<1x128xf32, #tpu.memory_space<vmem>>, %arg8: memref<32x128xbf16, #tpu.memory_space<vmem>>) attributes {dimension_semantics = [#tpu.dimension_semantics<parallel>], iteration_bounds = array<i64: 1>, scalar_prefetch = 0 : i64, scratch_operands = 0 : i64, tpu.core_type = #tpu.core_type<tc>, window_params = [{transform_indices = @transform_0, window_bounds = array<i64: 32, 784>}, {pipeline_mode = #tpu.pipeline_mode<synchronous>, transform_indices = @transform_1, window_bounds = array<i64: 784, 128>}, {pipeline_mode = #tpu.pipeline_mode<synchronous>, transform_indices = @transform_2, window_bounds = array<i64: 1, 128>}, {pipeline_mode = #tpu.pipeline_mode<synchronous>, transform_indices = @transform_3, window_bounds = array<i64: 128, 128>}, {pipeline_mode = #tpu.pipeline_mode<synchronous>, transform_indices = @transform_4, window_bounds = array<i64: 1, 128>}, {pipeline_mode = #tpu.pipeline_mode<synchronous>, transform_indices = @transform_5, window_bounds = array<i64: 128, 128>}, {pipeline_mode = #tpu.pipeline_mode<synchronous>, transform_indices = @transform_6, window_bounds = array<i64: 1, 128>}, {transform_indices = @transform_7, window_bounds = array<i64: 32, 128>}]} {
    %c0 = arith.constant 0 : index
    %c0_0 = arith.constant 0 : index
    %0 = vector.load %arg1[%c0, %c0_0] : memref<32x784xf32, #tpu.memory_space<vmem>>, vector<32x784xf32>
    %1 = arith.truncf %0 : vector<32x784xf32> to vector<32x784xbf16>
    %c0_1 = arith.constant 0 : index
    %c0_2 = arith.constant 0 : index
    %2 = vector.load %arg2[%c0_1, %c0_2] : memref<784x128xbf16, #tpu.memory_space<vmem>>, vector<784x128xbf16>
    %cst = arith.constant dense<0.000000e+00> : vector<32x128xf32>
    %3 = tpu.matmul %1, %2, %cst {dimension_numbers = #tpu.dot_dimension_numbers<[1], [0], [0], [1], [0, 0, 1, 1], [], []>} : vector<32x784xbf16>, vector<784x128xbf16>, vector<32x128xf32> -> vector<32x128xf32>
    %c0_3 = arith.constant 0 : index
    %c0_4 = arith.constant 0 : index
    %4 = vector.load %arg3[%c0_3, %c0_4] : memref<1x128xf32, #tpu.memory_space<vmem>>, vector<1x128xf32>
    %5 = vector.broadcast %4 : vector<1x128xf32> to vector<32x128xf32>
    %6 = arith.addf %3, %5 : vector<32x128xf32>
    %cst_5 = arith.constant 0.000000e+00 : f32
    %7 = vector.broadcast %cst_5 : f32 to vector<32x128xf32>
    %8 = arith.maximumf %6, %7 : vector<32x128xf32>
    %9 = arith.truncf %8 : vector<32x128xf32> to vector<32x128xbf16>
    %c0_6 = arith.constant 0 : index
    %c0_7 = arith.constant 0 : index
    %10 = vector.load %arg4[%c0_6, %c0_7] : memref<128x128xbf16, #tpu.memory_space<vmem>>, vector<128x128xbf16>
    %cst_8 = arith.constant dense<0.000000e+00> : vector<32x128xf32>
    %11 = tpu.matmul %9, %10, %cst_8 {dimension_numbers = #tpu.dot_dimension_numbers<[1], [0], [0], [1], [0, 0, 1, 1], [], []>} : vector<32x128xbf16>, vector<128x128xbf16>, vector<32x128xf32> -> vector<32x128xf32>
    %c0_9 = arith.constant 0 : index
    %c0_10 = arith.constant 0 : index
    %12 = vector.load %arg5[%c0_9, %c0_10] : memref<1x128xf32, #tpu.memory_space<vmem>>, vector<1x128xf32>
    %13 = vector.broadcast %12 : vector<1x128xf32> to vector<32x128xf32>
    %14 = arith.addf %11, %13 : vector<32x128xf32>
    %cst_11 = arith.constant 0.000000e+00 : f32
    %15 = vector.broadcast %cst_11 : f32 to vector<32x128xf32>
    %16 = arith.maximumf %14, %15 : vector<32x128xf32>
    %17 = arith.truncf %16 : vector<32x128xf32> to vector<32x128xbf16>
    %c0_12 = arith.constant 0 : index
    %c0_13 = arith.constant 0 : index
    %18 = vector.load %arg6[%c0_12, %c0_13] : memref<128x128xbf16, #tpu.memory_space<vmem>>, vector<128x128xbf16>
    %cst_14 = arith.constant dense<0.000000e+00> : vector<32x128xf32>
    %19 = tpu.matmul %17, %18, %cst_14 {dimension_numbers = #tpu.dot_dimension_numbers<[1], [0], [0], [1], [0, 0, 1, 1], [], []>} : vector<32x128xbf16>, vector<128x128xbf16>, vector<32x128xf32> -> vector<32x128xf32>
    %c0_15 = arith.constant 0 : index
    %c0_16 = arith.constant 0 : index
    %20 = vector.load %arg7[%c0_15, %c0_16] : memref<1x128xf32, #tpu.memory_space<vmem>>, vector<1x128xf32>
    %21 = vector.broadcast %20 : vector<1x128xf32> to vector<32x128xf32>
    %22 = arith.addf %19, %21 : vector<32x128xf32>
    %cst_17 = arith.constant 0.000000e+00 : f32
    %23 = vector.broadcast %cst_17 : f32 to vector<32x128xf32>
    %24 = arith.maximumf %22, %23 : vector<32x128xf32>
    %25 = tpu.iota {dimensions = array<i32: 1>} : vector<32x128xi32>
    %c10_i32 = arith.constant 10 : i32
    %26 = vector.broadcast %c10_i32 : i32 to vector<32x128xi32>
    %27 = arith.cmpi slt, %25, %26 : vector<32x128xi32>
    %cst_18 = arith.constant -1.000000e+30 : f32
    %28 = vector.broadcast %cst_18 : f32 to vector<32x128xf32>
    %29 = arith.select %27, %24, %28 : vector<32x128xi1>, vector<32x128xf32>
    %cst_19 = arith.constant dense<0xFF800000> : vector<32xf32>
    %30 = vector.multi_reduction <maximumf>, %29, %cst_19 [1] : vector<32x128xf32> to vector<32xf32>
    %31 = vector.shape_cast %30 : vector<32xf32> to vector<32x1xf32>
    %32 = vector.broadcast %31 : vector<32x1xf32> to vector<32x128xf32>
    %33 = arith.subf %29, %32 : vector<32x128xf32>
    %34 = math.exp %33 : vector<32x128xf32>
    %cst_20 = arith.constant dense<0.000000e+00> : vector<32xf32>
    %35 = vector.multi_reduction <add>, %34, %cst_20 [1] : vector<32x128xf32> to vector<32xf32>
    %36 = vector.shape_cast %35 : vector<32xf32> to vector<32x1xf32>
    %37 = math.log %36 : vector<32x1xf32>
    %38 = vector.broadcast %37 : vector<32x1xf32> to vector<32x128xf32>
    %39 = arith.subf %33, %38 : vector<32x128xf32>
    %40 = arith.truncf %39 : vector<32x128xf32> to vector<32x128xbf16>
    %c0_21 = arith.constant 0 : index
    %c0_22 = arith.constant 0 : index
    %41 = vector.load %arg8[%c0_21, %c0_22] : memref<32x128xbf16, #tpu.memory_space<vmem>>, vector<32x128xbf16>
    tpu.vector_store %arg8[%c0_21, %c0_22], %40 {strides = array<i32>} : memref<32x128xbf16, #tpu.memory_space<vmem>>, vector<32x128xbf16>,
    return
  }
  func.func @transform_0(%arg0: i32) -> (i32, i32) {
    %c0_i32 = arith.constant 0 : i32
    %c0_i32_0 = arith.constant 0 : i32
    return %arg0, %c0_i32 : i32, i32
  }
  func.func @transform_1(%arg0: i32) -> (i32, i32) {
    %c0_i32 = arith.constant 0 : i32
    %c0_i32_0 = arith.constant 0 : i32
    %c0_i32_1 = arith.constant 0 : i32
    return %c0_i32, %c0_i32_0 : i32, i32
  }
  func.func @transform_2(%arg0: i32) -> (i32, i32) {
    %c0_i32 = arith.constant 0 : i32
    %c0_i32_0 = arith.constant 0 : i32
    %c0_i32_1 = arith.constant 0 : i32
    return %c0_i32, %c0_i32_0 : i32, i32
  }
  func.func @transform_3(%arg0: i32) -> (i32, i32) {
    %c0_i32 = arith.constant 0 : i32
    %c0_i32_0 = arith.constant 0 : i32
    %c0_i32_1 = arith.constant 0 : i32
    return %c0_i32, %c0_i32_0 : i32, i32
  }
  func.func @transform_4(%arg0: i32) -> (i32, i32) {
    %c0_i32 = arith.constant 0 : i32
    %c0_i32_0 = arith.constant 0 : i32
    %c0_i32_1 = arith.constant 0 : i32
    return %c0_i32, %c0_i32_0 : i32, i32
  }
  func.func @transform_5(%arg0: i32) -> (i32, i32) {
    %c0_i32 = arith.constant 0 : i32
    %c0_i32_0 = arith.constant 0 : i32
    %c0_i32_1 = arith.constant 0 : i32
    return %c0_i32, %c0_i32_0 : i32, i32
  }
  func.func @transform_6(%arg0: i32) -> (i32, i32) {
    %c0_i32 = arith.constant 0 : i32
    %c0_i32_0 = arith.constant 0 : i32
    %c0_i32_1 = arith.constant 0 : i32
    return %c0_i32, %c0_i32_0 : i32, i32
  }
  func.func @transform_7(%arg0: i32) -> (i32, i32) {
    %c0_i32 = arith.constant 0 : i32
    %c0_i32_0 = arith.constant 0 : i32
    return %arg0, %c0_i32 : i32, i32
  }
}

</mosaic_0001>

<bundles_post_ra>
// kernel: tpu_custom_call.1
= control target key start
LH: loop header
LB: loop body
LE: loop exit
PB: predicated region body
PF: predicated region fallthrough
CT: control target
= control target key end

     0   :  { %12 = vsyncpa [#allocation3], 0  ;;  %s1656_s0 = inlined_call_operand.hbm [shape: f32[32,784], index: 0, kind: input, shape index: {}]   ;;  %s1657_s1 = inlined_call_operand.hbm [shape: bf16[784,128], index: 1, kind: input, shape index: {}]   ;;  %s1658_s2 = inlined_call_operand.vmem [shape: f32[1,128], index: 2, kind: input, shape index: {}]   ;;  %s1659_s3 = inlined_call_operand.hbm [shape: bf16[128,128], index: 3, kind: input, shape index: {}]   ;;  %s1660_s4 = inlined_call_operand.vmem [shape: f32[1,128], index: 4, kind: input, shape index: {}]   ;;  %s1661_s5 = inlined_call_operand.hbm [shape: bf16[128,128], index: 5, kind: input, shape index: {}]   ;;  %s1662_s6 = inlined_call_operand.vmem [shape: f32[1,128], index: 6, kind: input, shape index: {}]   ;;  %s1663_s7 = inlined_call_operand.hbm [shape: bf16[32,128], index: 7, kind: output, shape index: {}]  }
   0x1   :  { %13 = vsyncpa [#allocation6], 0 }
   0x2   :  { %14 = vsyncpa [#allocation9], 0 }
   0x3   :  { %15 = vsyncpa [#allocation4], 0  ;;  %s1519_s24 = smov [#allocation5]   ;;  %s1401_s28 = scalar_lea.hbm %s1657_s1, 6272 }
   0x4   :  { %s33_s25 = sshll.u32 %s1519_s24, 4  ;;  %p1402_p0 = scmp.ne.s32.totalorder %s1657_s1, %s1401_s28  ;;  %s34_s25 = int_to_ptr.vmem [resolvable:$true] %s33_s25 }
   0x5   :  { %p1405_p1 = scmp.lt.u32.totalorder %s1401_s28, %s1657_s1 }
   0x7   :  { %p1407_p2 = pnand %p1405_p1, %p1402_p0 }
   0x9   :  { %1410 = shalt.err (!%p1407_p2)
}
   0xa   :  { %s1411_s10 = scalar_lea.vmem %s34_s25, 6272  ;;  %p1416_p4 = scmp.lt.s32.totalorder %s34_s25, %s34_s25 }
   0xb   :  { %p1412_p3 = scmp.ne.s32.totalorder %s34_s25, %s1411_s10  ;;  %p1417_p5 = scmp.lt.s32.totalorder %s1411_s10, %s1411_s10 }
   0xd   :  { %p1418_p6 = por %p1417_p5, %p1416_p4 }
   0xf   :  { %p1419_p7 = pnand %p1418_p6, %p1412_p3 }
  0x11   :  { %1422 = shalt.err (!%p1419_p7)
}
  0x12   :  { %s1520_s11 = smov 64   ;;  %s1521_s12 = smov 4  }
  0x13   :  { %39 = dma.hbm_to_vmem [thread:$0]  %s1657_s1, 6272, %s34_s25, [#allocation6], %s1520_s11, %s1520_s11, %s1521_s12  }
  0x14   :  { %s1522_s15 = smov [#allocation2]   ;;  %s1423_s19 = scalar_lea.hbm %s1656_s0, 3584 }
  0x15   :  { %s21_s16 = sshll.u32 %s1522_s15, 4  ;;  %p1424_p8 = scmp.ne.s32.totalorder %s1656_s0, %s1423_s19  ;;  %s22_s16 = int_to_ptr.vmem [resolvable:$true] %s21_s16 }
  0x16   :  { %p1427_p9 = scmp.lt.u32.totalorder %s1423_s19, %s1656_s0 }
  0x18   :  { %p1429_p10 = pnand %p1427_p9, %p1424_p8 }
  0x1a   :  { %1432 = shalt.err (!%p1429_p10)
}
  0x1b   :  { %s1433_s24 = scalar_lea.vmem %s22_s16, 3584  ;;  %p1438_p12 = scmp.lt.s32.totalorder %s22_s16, %s22_s16 }
  0x1c   :  { %p1434_p11 = scmp.ne.s32.totalorder %s22_s16, %s1433_s24  ;;  %p1439_p13 = scmp.lt.s32.totalorder %s1433_s24, %s1433_s24 }
  0x1e   :  { %p1440_p0 = por %p1439_p13, %p1438_p12 }
  0x20   :  { %p1441_p1 = pnand %p1440_p0, %p1434_p11 }
  0x22   :  { %1444 = shalt.err (!%p1441_p1)
}
  0x23   :  { %s1523_s1 = smov 896   ;;  %s1524_s25 = smov 56  }
  0x24   :  { %27 = dma.hbm_to_vmem [thread:$0]  %s1656_s0, 3584, %s22_s16, [#allocation3], %s1523_s1, %s1523_s1, %s1524_s25  }
  0x25   :  { %s1525_s28 = smov [#allocation7]   ;;  %s1526_s30 = smov [#allocation8]  }
  0x26   :  { %s47_s29 = sshll.u32 %s1525_s28, 4  ;;  %s61_s8 = sshll.u32 %s1526_s30, 4  ;;  %s48_s29 = int_to_ptr.vmem [resolvable:$true] %s47_s29  ;;  %s1595_s8 = int_to_ptr.vmem [resolvable:$true] %s61_s8 }
  0x27   :  { %s1445_s13 = scalar_lea.hbm %s1659_s3, 1024 }
  0x28   :  { %p1446_p2 = scmp.ne.s32.totalorder %s1659_s3, %s1445_s13  ;;  %p1449_p3 = scmp.lt.u32.totalorder %s1445_s13, %s1659_s3 }
  0x2a   :  { %p1451_p4 = pnand %p1449_p3, %p1446_p2 }
  0x2c   :  { %1454 = shalt.err (!%p1451_p4)
}
  0x2d   :  { %s1455_s0 = scalar_lea.vmem %s48_s29, 1024  ;;  %p1460_p6 = scmp.lt.s32.totalorder %s48_s29, %s48_s29 }
  0x2e   :  { %p1456_p5 = scmp.ne.s32.totalorder %s48_s29, %s1455_s0  ;;  %p1461_p7 = scmp.lt.s32.totalorder %s1455_s0, %s1455_s0 }
  0x30   :  { %p1462_p8 = por %p1461_p7, %p1460_p6 }
  0x32   :  { %p1463_p9 = pnand %p1462_p8, %p1456_p5 }
  0x34   :  { %1466 = shalt.err (!%p1463_p9)
}
  0x35   :  { %53 = dma.hbm_to_vmem [thread:$0]  %s1659_s3, 1024, %s48_s29, [#allocation6], %s1520_s11, %s1520_s11, %s1521_s12  }
  0x36   :  { %s1467_s22 = scalar_lea.hbm %s1661_s5, 1024 }
  0x37   :  { %p1468_p10 = scmp.ne.s32.totalorder %s1661_s5, %s1467_s22  ;;  %p1471_p11 = scmp.lt.u32.totalorder %s1467_s22, %s1661_s5 }
  0x39   :  { %p1473_p12 = pnand %p1471_p11, %p1468_p10 }
  0x3b   :  { %1476 = shalt.err (!%p1473_p12)
}
  0x3c   :  { %s1477_s26 = scalar_lea.vmem %s1595_s8, 1024  ;;  %p1482_p0 = scmp.lt.s32.totalorder %s1595_s8, %s1595_s8 }
  0x3d   :  { %p1478_p13 = scmp.ne.s32.totalorder %s1595_s8, %s1477_s26  ;;  %p1483_p1 = scmp.lt.s32.totalorder %s1477_s26, %s1477_s26 }
  0x3f   :  { %p1484_p2 = por %p1483_p1, %p1482_p0 }
  0x41   :  { %p1485_p3 = pnand %p1484_p2, %p1478_p13 }
  0x43   :  { %1488 = shalt.err (!%p1485_p3)
}
  0x44   :  { %67 = dma.hbm_to_vmem [thread:$0]  %s1661_s5, 1024, %s1595_s8, [#allocation9], %s1520_s11, %s1520_s11, %s1521_s12  }
  0x45   :  { %1511 = dma.done.wait [#allocation3], 3584  }
  0x46   :  { %1512 = vsyncadd [#allocation3], 4294963712 }
  0x47   :  { %1513 = dma.done.wait [#allocation6], 7296  }
  0x48   :  { %1514 = vsyncadd [#allocation6], 4294960000 }
  0x49   :  { %1515 = dma.done.wait [#allocation9], 1024  }
  0x4a   :  { %1516 = vsyncadd [#allocation9], 4294966272  ;;  %v1320_v0 = vld [vmem:[#allocation5 + $0x40] sm:$0xff]   ;;  %v1324_v4 = vld [vmem:[#allocation5 + $0x48] sm:$0xff]   ;;  %vm524_vm0 = vcmask 130048  }
  0x4b   :  { %v1321_v1 = vld [vmem:[#allocation5] sm:$0xff]   ;;  %1158 = vmatprep.subr.bf16.mxu0 %v1320_v0  ;;  %v1325_v5 = vld [vmem:[#allocation5 + $0x8] sm:$0xff]   ;;  %v1328_v8 = vld [vmem:[#allocation5 + $0x50] sm:$0xff]  }
  0x4c   :  { %v1322_v2 = vld [vmem:[#allocation5 + $0xc0] sm:$0xff]   ;;  %1159 = vmatpush3.bf16.msra.mxu0 %v1321_v1  ;;  %v1326_v6 = vld [vmem:[#allocation5 + $0xc8] sm:$0xff]   ;;  %v1329_v9 = vld [vmem:[#allocation5 + $0x10] sm:$0xff]  }
  0x4d   :  { %v1323_v3 = vld [vmem:[#allocation5 + $0x80] sm:$0xff]   ;;  %1186 = vmatprep.subr.bf16.mxu1 %v1322_v2  ;;  %1160 = vmatprep.subr.bf16.mxu0 %v1324_v4  ;;  %v1327_v7 = vld [vmem:[#allocation5 + $0x88] sm:$0xff]   ;;  %v1330_v10 = vld [vmem:[#allocation5 + $0xd0] sm:$0xff]  }
  0x4e   :  { %1187 = vmatpush3.bf16.msra.mxu1 %v1323_v3  ;;  %v1331_v11 = vld [vmem:[#allocation5 + $0x90] sm:$0xff]   ;;  %v1332_v12 = vld [vmem:[#allocation5 + $0x58] sm:$0xff]   ;;  %v1336_v16 = vld [vmem:[#allocation5 + $0x60] sm:$0xff]  }
  0x4f   :  { %1188 = vmatprep.subr.bf16.mxu1 %v1326_v6  ;;  %v1333_v13 = vld [vmem:[#allocation5 + $0x18] sm:$0xff]   ;;  %v1337_v17 = vld [vmem:[#allocation5 + $0x20] sm:$0xff]   ;;  %v1340_v20 = vld [vmem:[#allocation5 + $0x68] sm:$0xff]  }
  0x50   :  { %1161 = vmatpush3.bf16.msra.mxu0 %v1325_v5  ;;  %v1334_v14 = vld [vmem:[#allocation5 + $0xd8] sm:$0xff]   ;;  %v1338_v18 = vld [vmem:[#allocation5 + $0xe0] sm:$0xff]   ;;  %v1341_v21 = vld [vmem:[#allocation5 + $0x28] sm:$0xff]  }
  0x51   :  { %1162 = vmatprep.subr.bf16.mxu0 %v1328_v8  ;;  %v1335_v15 = vld [vmem:[#allocation5 + $0x98] sm:$0xff]   ;;  %v1339_v19 = vld [vmem:[#allocation5 + $0xa0] sm:$0xff]   ;;  %v1342_v22 = vld [vmem:[#allocation5 + $0xe8] sm:$0xff]  }
  0x52   :  { %1189 = vmatpush3.bf16.msra.mxu1 %v1327_v7  ;;  %v1343_v23 = vld [vmem:[#allocation5 + $0xa8] sm:$0xff]   ;;  %v1344_v24 = vld [vmem:[#allocation5 + $0x70] sm:$0xff]   ;;  %v1348_v28 = vld [vmem:[#allocation5 + $0x78] sm:$0xff]  }
  0x53   :  { %1190 = vmatprep.subr.bf16.mxu1 %v1330_v10  ;;  %v1345_v25 = vld [vmem:[#allocation5 + $0x30] sm:$0xff]   ;;  %v1349_v29 = vld [vmem:[#allocation5 + $0x38] sm:$0xff]   ;;  %v84_v31 = vld [vmem:[#allocation2 + $0x8] sm:$0xff] }
  0x54   :  { %1163 = vmatpush3.bf16.msra.mxu0 %v1329_v9  ;;  %v1346_v26 = vld [vmem:[#allocation5 + $0xf0] sm:$0xff]   ;;  %v1350_v30 = vld [vmem:[#allocation5 + $0xf8] sm:$0xff]   ;;  %v91_v32 = vld [vmem:[#allocation2 + $0x40] sm:$0xff] }
  0x55   :  { %1164 = vmatprep.subr.bf16.mxu0 %v1332_v12  ;;  %v1347_v27 = vld [vmem:[#allocation5 + $0xb0] sm:$0xff]   ;;  %v112_v33 = vpack.c.bf16 %v91_v32, %v84_v31  ;;  %v1351_v34 = vld [vmem:[#allocation5 + $0xb8] sm:$0xff]   ;;  %v83_v35 = vld [vmem:[#allocation2] sm:$0xff] }
  0x56   :  { %1191 = vmatpush3.bf16.msra.mxu1 %v1331_v11  ;;  %v90_v36 = vld [vmem:[#allocation2 + $0x38] sm:$0xff]  ;;  %v1352_v38 = vld [vmem:[#allocation5 + $0x140] sm:$0xff]   ;;  %v93_v40 = vld [vmem:[#allocation2 + $0x50] sm:$0xff] }
  0x57   :  { %1192 = vmatprep.subr.bf16.mxu1 %v1334_v14  ;;  %563 = vmatprep.mubr.bf16.mxu0 %v112_v33  ;;  %v111_v37 = vpack.c.bf16 %v90_v36, %v83_v35  ;;  %v86_v39 = vld [vmem:[#allocation2 + $0x18] sm:$0xff]  ;;  %v1353_v42 = vld [vmem:[#allocation5 + $0x100] sm:$0xff]   ;;  %v85_v43 = vld [vmem:[#allocation2 + $0x10] sm:$0xff] }
  0x58   :  { %1165 = vmatpush3.bf16.msra.mxu0 %v1333_v13  ;;  %v114_v41 = vpack.c.bf16 %v93_v40, %v86_v39  ;;  %v92_v44 = vld [vmem:[#allocation2 + $0x48] sm:$0xff]  ;;  %v1356_v48 = vld [vmem:[#allocation5 + $0x150] sm:$0xff]   ;;  %v1358_v50 = vld [vmem:[#allocation5 + $0x158] sm:$0xff]  }
  0x59   :  { %1166 = vmatprep.subr.bf16.mxu0 %v1336_v16  ;;  %v113_v45 = vpack.c.bf16 %v92_v44, %v85_v43  ;;  %v1354_v46 = vld [vmem:[#allocation5 + $0x148] sm:$0xff]   ;;  %v1357_v49 = vld [vmem:[#allocation5 + $0x110] sm:$0xff]   ;;  %v1359_v51 = vld [vmem:[#allocation5 + $0x118] sm:$0xff]  }
  0x5a   :  { %1193 = vmatpush3.bf16.msra.mxu1 %v1335_v15  ;;  %612 = vmatprep.mubr.bf16.mxu1 %v114_v41  ;;  %v1355_v47 = vld [vmem:[#allocation5 + $0x108] sm:$0xff]   ;;  %v98_v52 = vld [vmem:[#allocation2 + $0x78] sm:$0xff]  ;;  %v105_v53 = vld [vmem:[#allocation2 + $0xb0] sm:$0xff] }
  0x5b   :  { %1194 = vmatprep.subr.bf16.mxu1 %v1338_v18  ;;  %v1360_v54 = vld [vmem:[#allocation5 + $0x160] sm:$0xff]   ;;  %v119_v55 = vpack.c.bf16 %v105_v53, %v98_v52  ;;  %v97_v56 = vld [vmem:[#allocation2 + $0x70] sm:$0xff]  ;;  %v104_v57 = vld [vmem:[#allocation2 + $0xa8] sm:$0xff] }
  0x5c   :  { %1167 = vmatpush3.bf16.msra.mxu0 %v1337_v17  ;;  %v1361_v58 = vld [vmem:[#allocation5 + $0x120] sm:$0xff]   ;;  %v118_v59 = vpack.c.bf16 %v104_v57, %v97_v56  ;;  %v100_v60 = vld [vmem:[#allocation2 + $0x88] sm:$0xff]  ;;  %v106_v0 = vld [vmem:[#allocation2 + $0xb8] sm:$0xff] }
  0x5d   :  { %1168 = vmatprep.subr.bf16.mxu0 %v1340_v20  ;;  %v107_v61 = vld [vmem:[#allocation2 + $0xc0] sm:$0xff]  ;;  %v1362_v1 = vld [vmem:[#allocation5 + $0x168] sm:$0xff]   ;;  %v1364_v5 = vld [vmem:[#allocation5 + $0x170] sm:$0xff]  }
  0x5e   :  { %1195 = vmatpush3.bf16.msra.mxu1 %v1339_v19  ;;  %v99_v62 = vld [vmem:[#allocation2 + $0x80] sm:$0xff]  ;;  %v121_v63 = vpack.c.bf16 %v107_v61, %v100_v60  ;;  %v1363_v4 = vld [vmem:[#allocation5 + $0x128] sm:$0xff]   ;;  %v89_v9 = vld [vmem:[#allocation2 + $0x30] sm:$0xff] }
  0x5f   :  { %1196 = vmatprep.subr.bf16.mxu1 %v1342_v22  ;;  %v120_v2 = vpack.c.bf16 %v106_v0, %v99_v62  ;;  %v1366_v3 = vld [vmem:[#allocation5 + $0x180] sm:$0xff]   ;;  %v88_v6 = vld [vmem:[#allocation2 + $0x28] sm:$0xff]  ;;  %v110_v12 = vld [vmem:[#allocation2 + $0xd8] sm:$0xff] }
  0x60   :  { %1169 = vmatpush3.bf16.msra.mxu0 %v1341_v21  ;;  %v95_v7 = vld [vmem:[#allocation2 + $0x60] sm:$0xff]  ;;  %v96_v10 = vld [vmem:[#allocation2 + $0x68] sm:$0xff]  ;;  %v1365_v13 = vld [vmem:[#allocation5 + $0x130] sm:$0xff]  }
  0x61   :  { %1170 = vmatprep.subr.bf16.mxu0 %v1344_v24  ;;  %v116_v8 = vpack.c.bf16 %v95_v7, %v88_v6  ;;  %v103_v11 = vld [vmem:[#allocation2 + $0xa0] sm:$0xff]  ;;  %v117_v14 = vpack.c.bf16 %v96_v10, %v89_v9  ;;  %v1367_v16 = vld [vmem:[#allocation5 + $0x178] sm:$0xff]   ;;  %v109_v21 = vld [vmem:[#allocation2 + $0xd0] sm:$0xff] }
  0x62   :  { %1197 = vmatpush3.bf16.msra.mxu1 %v1343_v23  ;;  %v124_v15 = vpack.c.bf16 %v110_v12, %v103_v11  ;;  %v1368_v17 = vld [vmem:[#allocation5 + $0x138] sm:$0xff]   ;;  %v87_v18 = vld [vmem:[#allocation2 + $0x20] sm:$0xff]  ;;  %v101_v24 = vld [vmem:[#allocation2 + $0x90] sm:$0xff] }
  0x63   :  { %1198 = vmatprep.subr.bf16.mxu1 %v1346_v26  ;;  %v94_v19 = vld [vmem:[#allocation2 + $0x58] sm:$0xff]  ;;  %v1373_v31 = vld [vmem:[#allocation7 + $0x20] sm:$0xff]   ;;  %v1374_v32 = vld [vmem:[#allocation7 + $0x28] sm:$0xff]  }
  0x64   :  { %1171 = vmatpush3.bf16.msra.mxu0 %v1345_v25  ;;  %v102_v20 = vld [vmem:[#allocation2 + $0x98] sm:$0xff]  ;;  %v115_v22 = vpack.c.bf16 %v94_v19, %v87_v18  ;;  %v108_v25 = vld [vmem:[#allocation2 + $0xc8] sm:$0xff]  ;;  %v1378_v36 = vld [vmem:[#allocation8 + $0x8] sm:$0xff]  }
  0x65   :  { %1172 = vmatprep.subr.bf16.mxu0 %v1348_v28  ;;  %v123_v23 = vpack.c.bf16 %v109_v21, %v102_v20  ;;  %v122_v26 = vpack.c.bf16 %v108_v25, %v101_v24  ;;  %v1370_v28 = vld [vmem:[#allocation7 + $0x8] sm:$0xff]   ;;  %v1375_v33 = vld [vmem:[#allocation7 + $0x30] sm:$0xff]   ;;  %v1377_v35 = vld [vmem:[#allocation8] sm:$0xff]  }
  0x66   :  { %1199 = vmatpush3.bf16.msra.mxu1 %v1347_v27  ;;  %v1369_v27 = vld [vmem:[#allocation7] sm:$0xff]   ;;  %v1382_v40 = vld [vmem:[#allocation8 + $0x28] sm:$0xff]  }
  0x67   :  { %1200 = vmatprep.subr.bf16.mxu1 %v1350_v30  ;;  %v1372_v30 = vld [vmem:[#allocation7 + $0x18] sm:$0xff]   ;;  %v1381_v39 = vld [vmem:[#allocation8 + $0x20] sm:$0xff]  }
  0x68   :  { %1173 = vmatpush3.bf16.msra.mxu0 %v1349_v29  ;;  %v1371_v29 = vld [vmem:[#allocation7 + $0x10] sm:$0xff]  }
  0x69   :  { %1214 = vmatprep.subr.bf16.mxu0 %v1352_v38  ;;  %v1380_v38 = vld [vmem:[#allocation8 + $0x18] sm:$0xff]  }
  0x6a   :  { %1201 = vmatpush3.bf16.msra.mxu1 %v1351_v34  ;;  %v1376_v34 = vld [vmem:[#allocation7 + $0x38] sm:$0xff]  }
  0x6b   :  { %564 = vmatmul.mubr.bf16.vlgmr.msra.gmra.mrb[0].mxu0 %v111_v37  ;;  %1265 = vmatprep.subr.bf16.mxu1 %v1366_v3  ;;  %v1379_v37 = vld [vmem:[#allocation8 + $0x10] sm:$0xff]  }
  0x6c   :  { %1215 = vmatpush3.bf16.msra.mxu0 %v1353_v42  ;;  %571 = vmatprep.mubr.bf16.mxu0 %v119_v55  ;;  %v1069_v42 = vld [vmem:[%s1658_s2] ss:$0 sm:$0xff] }
  0x6d   :  { %613 = vmatmul.mubr.bf16.vlgmr.msra.gmra.mrb[0].mxu1 %v113_v45  ;;  %1216 = vmatprep.subr.bf16.mxu0 %v1354_v46 }
  0x6e   :  { %620 = vmatprep.mubr.bf16.mxu1 %v121_v63  ;;  %1266 = vmatpush3.bf16.msra.mxu1 %v1366_v3 }
  0x6f   :  { %1271 = vmatprep.subr.bf16.mxu1 %v1369_v27 }
  0x70   :  { %1217 = vmatpush3.bf16.msra.mxu0 %v1355_v47 }
  0x71   :  { %1218 = vmatprep.subr.bf16.mxu0 %v1356_v48 }
  0x73   :  { %572 = vmatmul.mubr.bf16.gmra.mrb[4].mxu0 %v118_v59 }
  0x74   :  { %1219 = vmatpush3.bf16.msra.mxu0 %v1357_v49  ;;  %661 = vmatprep.mubr.bf16.mxu0 %v116_v8 }
  0x75   :  { %1220 = vmatprep.subr.bf16.mxu0 %v1358_v50  ;;  %621 = vmatmul.mubr.bf16.gmra.mrb[4].mxu1 %v120_v2 }
  0x76   :  { %1267 = vmatprep.mubr.msk.bf16.mxu1 %vm524_vm0, %v117_v14 }
  0x78   :  { %1221 = vmatpush3.bf16.msra.mxu0 %v1359_v51 }
  0x79   :  { %1222 = vmatprep.subr.bf16.mxu0 %v1360_v54 }
  0x7c   :  { %1223 = vmatpush3.bf16.msra.mxu0 %v1361_v58 }
  0x7d   :  { %1224 = vmatprep.subr.bf16.mxu0 %v1362_v1  ;;  %1268 = vmatmul.mubr.msk.bf16.vlgmr.msra.gmra.mrb[8].mxu1 %vm524_vm0, %v124_v15 }
  0x7e   :  { %1272 = vmatpush3.bf16.msra.mxu1 %v1369_v27 }
  0x7f   :  { %1273 = vmatprep.subr.bf16.mxu1 %v1370_v28 }
  0x80   :  { %1225 = vmatpush3.bf16.msra.mxu0 %v1363_v4 }
  0x81   :  { %1226 = vmatprep.subr.bf16.mxu0 %v1364_v5 }
  0x82   :  { %1274 = vmatpush3.bf16.msra.mxu1 %v1370_v28 }
  0x83   :  { %1275 = vmatprep.subr.bf16.mxu1 %v1371_v29 }
  0x84   :  { %1227 = vmatpush3.bf16.msra.mxu0 %v1365_v13 }
  0x85   :  { %1228 = vmatprep.subr.bf16.mxu0 %v1367_v16 }
  0x86   :  { %1276 = vmatpush3.bf16.msra.mxu1 %v1371_v29 }
  0x87   :  { %1277 = vmatprep.subr.bf16.mxu1 %v1372_v30 }
  0x88   :  { %1229 = vmatpush3.bf16.msra.mxu0 %v1368_v17 }
  0x89   :  { %1291 = vmatprep.subr.bf16.mxu0 %v1377_v35 }
  0x8a   :  { %1278 = vmatpush3.bf16.msra.mxu1 %v1372_v30 }
  0x8b   :  { %662 = vmatmul.mubr.bf16.vlgmr.msra.gmra.mrb[8].mxu0 %v115_v22  ;;  %1279 = vmatprep.subr.bf16.mxu1 %v1373_v31 }
  0x8c   :  { %669 = vmatprep.mubr.bf16.mxu0 %v123_v23  ;;  %1292 = vmatpush3.bf16.msra.mxu0 %v1377_v35 }
  0x8d   :  { %1293 = vmatprep.subr.bf16.mxu0 %v1378_v36 }
  0x8e   :  { %1280 = vmatpush3.bf16.msra.mxu1 %v1373_v31 }
  0x8f   :  { %1281 = vmatprep.subr.bf16.mxu1 %v1374_v32 }
  0x90   :  { %1294 = vmatpush3.bf16.msra.mxu0 %v1378_v36 }
  0x91   :  { %1295 = vmatprep.subr.bf16.mxu0 %v1379_v37 }
  0x92   :  { %1282 = vmatpush3.bf16.msra.mxu1 %v1374_v32 }
  0x93   :  { %670 = vmatmul.mubr.bf16.gmra.mrb[12].mxu0 %v122_v26  ;;  %1283 = vmatprep.subr.bf16.mxu1 %v1375_v33 }
  0x94   :  { %1296 = vmatpush3.bf16.msra.mxu0 %v1379_v37 }
  0x95   :  { %1297 = vmatprep.subr.bf16.mxu0 %v1380_v38 }
  0x96   :  { %1284 = vmatpush3.bf16.msra.mxu1 %v1375_v33 }
  0x97   :  { %1285 = vmatprep.subr.bf16.mxu1 %v1376_v34 }
  0x98   :  { %1298 = vmatpush3.bf16.msra.mxu0 %v1380_v38 }
  0x99   :  { %1299 = vmatprep.subr.bf16.mxu0 %v1381_v39 }
  0x9a   :  { %1286 = vmatpush3.bf16.msra.mxu1 %v1376_v34 }
  0x9c   :  { %1300 = vmatpush3.bf16.msra.mxu0 %v1381_v39 }
  0x9d   :  { %1301 = vmatprep.subr.bf16.mxu0 %v1382_v40 }
  0xa0   :  { %1302 = vmatpush3.bf16.msra.mxu0 %v1382_v40  ;;  %v1383_v40 = vld [vmem:[#allocation8 + $0x30] sm:$0xff]  }
  0xa1   :  { %1303 = vmatprep.subr.bf16.mxu0 %v1383_v40 }
  0xa4   :  { %1304 = vmatpush3.bf16.msra.mxu0 %v1383_v40 }
 0x13e   :  { %v1174_v41 = vpop.f32.mrb[0].mxu0 }
 0x13f   :  { %v1175_v43 = vpop.f32.mrb[1].mxu0 }
 0x140   :  { %v1176_v44 = vadd.f32 %v1175_v43, %v1174_v41  ;;  %v1177_v45 = vpop.f32.mrb[2].mxu0  ;;  %v1202_v46 = vpop.f32.mrb[0].mxu1  ;;  %v1384_v41 = vld [vmem:[#allocation8 + $0x38] sm:$0xff]  }
 0x141   :  { %v1178_v47 = vpop.f32.mrb[3].mxu0  ;;  %v1203_v50 = vpop.f32.mrb[1].mxu1  ;;  %1305 = vmatprep.subr.bf16.mxu0 %v1384_v41 }
 0x142   :  { %v566_v48 = vadd.f32 %v1176_v44, %v1069_v42  ;;  %v1179_v49 = vadd.f32 %v1178_v47, %v1177_v45  ;;  %v1204_v51 = vadd.f32 %v1203_v50, %v1202_v46  ;;  %v1205_v52 = vpop.f32.mrb[2].mxu1  ;;  %1306 = vmatpush3.bf16.msra.mxu0 %v1384_v41 }
 0x143   :  { %v1206_v54 = vpop.f32.mrb[3].mxu1 }
 0x144   :  { %v569_v53 = vadd.f32 %v1179_v49, %v1069_v42  ;;  %v615_v55 = vadd.f32 %v1204_v51, %v566_v48  ;;  %v1207_v56 = vadd.f32 %v1206_v54, %v1205_v52 }
 0x146   :  { %v618_v57 = vadd.f32 %v1207_v56, %v569_v53  ;;  %v1180_v58 = vpop.f32.mrb[4].mxu0 }
 0x147   :  { %v1181_v59 = vpop.f32.mrb[5].mxu0 }
 0x148   :  { %v1182_v60 = vadd.f32 %v1181_v59, %v1180_v58  ;;  %v1183_v61 = vpop.f32.mrb[6].mxu0  ;;  %v1208_v62 = vpop.f32.mrb[4].mxu1  ;;  %v1130_v58 = vld [vmem:[%s1662_s6] ss:$0 sm:$0xff] }
 0x149   :  { %v1184_v63 = vpop.f32.mrb[7].mxu0  ;;  %v1209_v0 = vpop.f32.mrb[5].mxu1 }
 0x14a   :  { %v574_v1 = vadd.f32 %v1182_v60, %v1069_v42  ;;  %v1185_v2 = vadd.f32 %v1184_v63, %v1183_v61  ;;  %v1210_v3 = vadd.f32 %v1209_v0, %v1208_v62  ;;  %v1211_v4 = vpop.f32.mrb[6].mxu1 }
 0x14b   :  { %v1212_v5 = vpop.f32.mrb[7].mxu1 }
 0x14c   :  { %v577_v6 = vadd.f32 %v1185_v2, %v1069_v42  ;;  %v623_v7 = vadd.f32 %v1210_v3, %v574_v1  ;;  %v1213_v8 = vadd.f32 %v1212_v5, %v1211_v4  ;;  %v1121_v42 = vld [vmem:[%s1660_s4] ss:$0 sm:$0xff]  ;;  %s1527_s4 = smov [#allocation10]  }
 0x14d   :  { %s1055_s6 = sshll.u32 %s1527_s4, 4  ;;  %s1056_s6 = int_to_ptr.vmem [resolvable:$true] %s1055_s6 }
 0x14e   :  { %v626_v9 = vadd.f32 %v1213_v8, %v577_v6  ;;  %s1489_s9 = scalar_lea.vmem %s1056_s6, 256  ;;  %p1494_p5 = scmp.lt.s32.totalorder %s1056_s6, %s1056_s6 }
 0x14f   :  { %p1490_p4 = scmp.ne.s32.totalorder %s1056_s6, %s1489_s9  ;;  %p1495_p6 = scmp.lt.s32.totalorder %s1489_s9, %s1489_s9 }
 0x150   :  { %v1269_v10 = vpop.f32.mrb[8].mxu1 }
 0x151   :  { %v712_v11 = vpop.f32.mrb[9].mxu1  ;;  %p1496_p7 = por %p1495_p6, %p1494_p5 }
 0x152   :  { %v1270_v12 = vpop.f32.mrb[10].mxu1 }
 0x153   :  { %v715_v13 = vpop.f32.mrb[11].mxu1  ;;  %p1497_p8 = pnand %p1496_p7, %p1490_p4 }
 0x15e   :  { %v1230_v14 = vpop.f32.mrb[8].mxu0 }
 0x15f   :  { %v1231_v15 = vpop.f32.mrb[9].mxu0 }
 0x160   :  { %v1232_v16 = vadd.f32 %v1231_v15, %v1230_v14  ;;  %v1233_v17 = vpop.f32.mrb[10].mxu0 }
 0x161   :  { %v1234_v18 = vpop.f32.mrb[11].mxu0 }
 0x162   :  { %v1235_v19 = vadd.f32 %v1234_v18, %v1233_v17  ;;  %v664_v20 = vadd.f32 %v1232_v16, %v615_v55 }
 0x164   :  { %v713_v21 = vadd.f32 %v712_v11, %v664_v20  ;;  %v667_v22 = vadd.f32 %v1235_v19, %v618_v57  ;;  %v983_v57 = vlaneseq }
 0x166   :  { %v716_v23 = vadd.f32 %v715_v13, %v667_v22  ;;  %v1236_v24 = vpop.f32.mrb[12].mxu0  ;;  %v727_v26 = vmax.f32 %v713_v21, 0.0  ;;  %v984_v59 = vand.u32 127, %v983_v57 }
 0x167   :  { %v1237_v25 = vpop.f32.mrb[13].mxu0 }
 0x168   :  { %v728_v27 = vmax.f32 %v716_v23, 0.0  ;;  %v1238_v28 = vadd.f32 %v1237_v25, %v1236_v24  ;;  %v1239_v29 = vpop.f32.mrb[14].mxu0  ;;  %vm985_vm1 = vcmp.lt.s32.totalorder %v984_v59, 10 }
 0x169   :  { %v1240_v30 = vpop.f32.mrb[15].mxu0 }
 0x16a   :  { %v731_v31 = vpack.c.bf16 %v728_v27, %v727_v26  ;;  %v672_v32 = vadd.f32 %v1238_v28, %v623_v7  ;;  %v1241_v33 = vadd.f32 %v1240_v30, %v1239_v29 }
 0x16c   :  { %v721_v34 = vadd.f32 %v1269_v10, %v672_v32  ;;  %v675_v35 = vadd.f32 %v1241_v33, %v626_v9  ;;  %1287 = vmatprep.mubr.bf16.mxu1 %v731_v31 }
 0x16e   :  { %v724_v36 = vadd.f32 %v1270_v12, %v675_v35  ;;  %v729_v37 = vmax.f32 %v721_v34, 0.0 }
 0x170   :  { %v730_v38 = vmax.f32 %v724_v36, 0.0 }
 0x172   :  { %v732_v39 = vpack.c.bf16 %v730_v38, %v729_v37 }
 0x174   :  { %1288 = vmatmul.mubr.bf16.vlgmr.msra.gmra.mrb[12].mxu1 %v732_v39 }
 0x247   :  { %v1289_v43 = vpop.f32.mrb[12].mxu1 }
 0x248   :  { %v847_v44 = vadd.f32 %v1289_v43, %v1121_v42  ;;  %v838_v45 = vpop.f32.mrb[13].mxu1 }
 0x249   :  { %v839_v46 = vadd.f32 %v1121_v42, %v838_v45  ;;  %v1290_v47 = vpop.f32.mrb[14].mxu1 }
 0x24a   :  { %v850_v48 = vadd.f32 %v1290_v47, %v1121_v42  ;;  %v841_v49 = vpop.f32.mrb[15].mxu1  ;;  %v855_v51 = vmax.f32 %v847_v44, 0.0 }
 0x24b   :  { %v842_v50 = vadd.f32 %v1121_v42, %v841_v49  ;;  %v853_v53 = vmax.f32 %v839_v46, 0.0 }
 0x24c   :  { %v856_v52 = vmax.f32 %v850_v48, 0.0 }
 0x24d   :  { %v854_v54 = vmax.f32 %v842_v50, 0.0 }
 0x24e   :  { %v858_v55 = vpack.c.bf16 %v856_v52, %v855_v51 }
 0x24f   :  { %v857_v56 = vpack.c.bf16 %v854_v54, %v853_v53 }
 0x251   :  { %1307 = vmatprep.mubr.bf16.mxu0 %v857_v56 }
 0x252   :  { %1308 = vmatmul.mubr.bf16.vlgmr.msra.gmra.mrb[16].mxu0 %v858_v55 }
 0x325   :  { %v1309_v60 = vpop.f32.mrb[16].mxu0 }
 0x326   :  { %v973_v61 = vadd.f32 %v1309_v60, %v1130_v58  ;;  %v964_v62 = vpop.f32.mrb[17].mxu0 }
 0x327   :  { %v965_v63 = vadd.f32 %v1130_v58, %v964_v62  ;;  %v1310_v0 = vpop.f32.mrb[18].mxu0 }
 0x328   :  { %v981_v1 = vmax.f32 %v973_v61, 0.0  ;;  %v976_v2 = vadd.f32 %v1310_v0, %v1130_v58  ;;  %v967_v3 = vpop.f32.mrb[19].mxu0 }
 0x329   :  { %v979_v4 = vmax.f32 %v965_v63, 0.0  ;;  %v968_v5 = vadd.f32 %v1130_v58, %v967_v3 }
 0x32a   :  { %v982_v6 = vmax.f32 %v976_v2, 0.0  ;;  %v988_v7 = vsel %vm985_vm1, %v981_v1, -1e+30 }
 0x32b   :  { %v980_v8 = vmax.f32 %v968_v5, 0.0  ;;  %994 = vmax.xlane.f32.xlu1 %v988_v7  ;;  %v986_v9 = vsel %vm985_vm1, %v979_v4, -1e+30 }
 0x32c   :  { %990 = vmax.xlane.f32.xlu0 %v986_v9  ;;  %v989_v10 = vsel %vm985_vm1, %v982_v6, -1e+30 }
 0x32d   :  { %v987_v11 = vsel %vm985_vm1, %v980_v8, -1e+30 }
 0x32f   :  { %996 = vmax.xlane.f32.xlu1 %v989_v10 }
 0x330   :  { %992 = vmax.xlane.f32.xlu0 %v987_v11 }
 0x3b8   :  { %v995_v12 = vpop.xlane.xlu1 %994 }
 0x3b9   :  { %v1000_v13 = vsub.f32 %v988_v7, %v995_v12  ;;  %v991_v14 = vpop.xlane.xlu0 %990 }
 0x3ba   :  { %v998_v15 = vsub.f32 %v986_v9, %v991_v14 }
 0x3bb   :  { %v1006_v18 = vmul.f32 1.442695, %v1000_v13 }
 0x3bc   :  { %v1002_v16 = vmul.f32 1.442695, %v998_v15  ;;  %v997_v17 = vpop.xlane.xlu1 %996 }
 0x3bd   :  { %v993_v19 = vpop.xlane.xlu0 %992  ;;  %v1001_v20 = vsub.f32 %v989_v10, %v997_v17 }
 0x3be   :  { %1385 = vpow2.f32 %v1002_v16  ;;  %v999_v21 = vsub.f32 %v987_v11, %v993_v19 }
 0x3bf   :  { %1387 = vpow2.f32 %v1006_v18  ;;  %v1008_v23 = vmul.f32 1.442695, %v1001_v20 }
 0x3c0   :  { %v1004_v22 = vmul.f32 1.442695, %v999_v21 }
 0x3c2   :  { %1389 = vpow2.f32 %v1004_v22 }
 0x3c3   :  { %1391 = vpow2.f32 %v1008_v23 }
 0x3c8   :  { %v1386_v24 = vpop.eup %1385 }
 0x3c9   :  { %1010 = vadd.xlane.f32.xlu0 %v1386_v24  ;;  %v1388_v25 = vpop.eup %1387 }
 0x3cc   :  { %v1390_v26 = vpop.eup %1389 }
 0x3cd   :  { %1014 = vadd.xlane.f32.xlu0 %v1388_v25  ;;  %1012 = vadd.xlane.f32.xlu1 %v1390_v26  ;;  %v1392_v27 = vpop.eup %1391 }
 0x3d1   :  { %1016 = vadd.xlane.f32.xlu1 %v1392_v27 }
 0x456   :  { %v1011_v28 = vpop.xlane.xlu0 %1010 }
 0x457   :  { %1393 = vlog2.f32 %v1011_v28 }
 0x45a   :  { %v1013_v29 = vpop.xlane.xlu1 %1012  ;;  %v1015_v30 = vpop.xlane.xlu0 %1014 }
 0x45b   :  { %1395 = vlog2.f32 %v1013_v29 }
 0x45c   :  { %1397 = vlog2.f32 %v1015_v30 }
 0x45e   :  { %v1017_v31 = vpop.xlane.xlu1 %1016 }
 0x45f   :  { %1399 = vlog2.f32 %v1017_v31 }
 0x461   :  { %v1394_v32 = vpop.eup %1393 }
 0x462   :  { %v1019_v33 = vmul.f32 0.6931472, %v1394_v32 }
 0x464   :  { %v1026_v37 = vsub.f32 %v998_v15, %v1019_v33 }
 0x465   :  { %v1396_v34 = vpop.eup %1395 }
 0x466   :  { %v1398_v35 = vpop.eup %1397  ;;  %v1021_v36 = vmul.f32 0.6931472, %v1396_v34 }
 0x467   :  { %v1023_v39 = vmul.f32 0.6931472, %v1398_v35 }
 0x468   :  { %v1027_v38 = vsub.f32 %v999_v21, %v1021_v36 }
 0x469   :  { %v1400_v40 = vpop.eup %1399  ;;  %v1028_v43 = vsub.f32 %v1000_v13, %v1023_v39 }
 0x46a   :  { %v1025_v41 = vmul.f32 0.6931472, %v1400_v40  ;;  %v1150_v42 = vpack.c.bf16 %v1027_v38, %v1026_v37 }
 0x46c   :  { %v1029_v44 = vsub.f32 %v1001_v20, %v1025_v41  ;;  %1151 = vst [vmem:[#allocation10] sm:$0xff] %v1150_v42  }
 0x46e   :  { %v1155_v45 = vpack.c.bf16 %v1029_v44, %v1028_v43 }
 0x470   :  { %1157 = vst [vmem:[#allocation10 + $0x8] sm:$0xff] %v1155_v45  }
 0x471   :  { %1500 = shalt.err (!%p1497_p8)
}
 0x472   :  { %s1501_s14 = scalar_lea.hbm %s1663_s7, 256 }
 0x473   :  { %p1502_p9 = scmp.ne.s32.totalorder %s1663_s7, %s1501_s14  ;;  %p1505_p10 = scmp.lt.u32.totalorder %s1501_s14, %s1663_s7 }
 0x475   :  { %p1507_p11 = pnand %p1505_p10, %p1502_p9 }
 0x477   :  { %1510 = shalt.err (!%p1507_p11)
}
 0x478   :  { %1061 = dma.vmem_to_hbm [thread:$0]  %s1056_s6, 256, %s1663_s7, [#allocation4], %s1520_s11, %s1520_s11, %s1521_s12  }
 0x479   :  { %1517 = dma.done.wait [#allocation4], 256  }
 0x47a   :  { %1518 = vsyncadd [#allocation4], 4294967040 }
 0x47b   :  { %1065 = vsyncpa [#allocation3], 1 }
 0x47c   :  { %1066 = vsyncpa [#allocation6], 1 }
 0x47d   :  { %1067 = vsyncpa [#allocation9], 1 }
 0x47e   :  { %1068 = vsyncpa [#allocation4], 1 }

</bundles_post_ra>
